<compile_context>
chip_gen: v5e
topology: v5e:2x2
jax: 0.10.0
libtpu: 0.0.40
codegen_flags: <defaults>
</compile_context>

<pallas_src>
import jax
import jax.numpy as jnp
from jax import lax
from jax.experimental import pallas as pl
from jax.experimental.pallas import tpu as pltpu

LANE = 128


def _round_up(x, m):
    return -(-x // m) * m


def _cdiv(a, b):
    return -(-a // b)


def _vmem_capacity_bytes():
    try:
        return int(pltpu.get_tpu_info().vmem_capacity_bytes)
    except Exception:
        return 64 * 1024 * 1024   # conservative (v7x per-TC VMEM)


# ----------------------------- Pallas kernel --------------------------------

def _energy_margin_kernel(params_ref, meta_ref, logits_ref, tgt_ref, out_ref):
    """Processes one (C, TILE_N) column-tile of the batch.

    params (SMEM f32[4]): [w, b, eta, unused]
    meta   (SMEM i32[1]): [n_valid]  (number of un-padded batch columns)
    logits_ref: VMEM (C, TILE_N)   (class axis on sublanes, batch on lanes)
    tgt_ref:    VMEM (1, TILE_N) int32
    out_ref:    VMEM (4, TILE_N) f32, resident across the inner ("arbitrary")
                grid axis; rows are lane-parallel partial sums of
                [known*sig_in, unknown*sig_out, known*ce, known_count].
    """
    step = pl.program_id(1)

    @pl.when(step == 0)
    def _init():
        out_ref[...] = jnp.zeros_like(out_ref)

    w = params_ref[0]
    b = params_ref[1]
    eta = params_ref[2]
    n_valid = meta_ref[0]

    tile_n = logits_ref.shape[1]

    # f32 math (supports bf16 inputs; mandatory on v5e which has no bf16 VPU).
    logits = logits_ref[...].astype(jnp.float32)          # [C, T]
    tgt = tgt_ref[...]                                     # [1, T] int32

    # Global batch index per lane — masks out the padded tail.
    col0 = (pl.program_id(0) * pl.num_programs(1) + step) * tile_n
    col = col0 + lax.broadcasted_iota(jnp.int32, tgt.shape, 1)        # [1, T]
    valid = col < n_valid
    known_f = jnp.logical_and(valid, tgt >= 0).astype(jnp.float32)    # [1, T]
    unknown_f = jnp.logical_and(valid, tgt < 0).astype(jnp.float32)   # [1, T]

    # Stable logsumexp over the class (sublane) axis.  `shifted` feeds both
    # the exp() and the picked-class select (single traversal of the tile).
    m = jnp.max(logits, axis=0, keepdims=True)                        # [1, T]
    shifted = logits - m                                              # [C, T]
    sumexp = jnp.sum(jnp.exp(shifted), axis=0, keepdims=True)         # [1, T]
    log_sumexp = jnp.log(sumexp)
    lse = m + log_sumexp                                              # [1, T]

    cls = lax.broadcasted_iota(jnp.int32, logits.shape, 0)            # [C, T]
    picked_shifted = jnp.sum(jnp.where(cls == tgt, shifted, 0.0),
                             axis=0, keepdims=True)                   # [1, T]
    # ce_i = logsumexp(logits_i) - logits_i[y_i]
    ce_rows = log_sumexp - picked_shifted

    # Energy sigmoid terms (logistic regression is w*x + b).
    sig_in = jax.nn.sigmoid(w * lse + b)                              # [1, T]
    sig_out = jax.nn.sigmoid(-(w * (lse - eta) + b))                  # [1, T]

    # Lane-parallel accumulation into the resident output block (VPU adds;
    # no XLU reductions, no SMEM scalar chain per grid step).
    out_ref[0:1, :] += known_f * sig_in
    out_ref[1:2, :] += unknown_f * sig_out
    out_ref[2:3, :] += known_f * ce_rows
    out_ref[3:4, :] += known_f


# ------------------------------ JAX wrapper ---------------------------------

class EnergyMarginLossPallas:
    """JAX/Pallas port of pytorch_ood.loss.scone.EnergyMarginLoss (forward only)."""

    def __init__(self, full_train_loss, eta=1.0, false_alarm_cutoff=0.05,
                 in_constraint_weight=1.0, ce_tol=2.0, ce_constraint_weight=1.0,
                 out_constraint_weight=1.0, lr_lam=1.0, penalty_mult=1.5,
                 constraint_tol=0.0):
        self.full_train_loss = float(full_train_loss)
        self.eta = float(eta)
        self.false_alarm_cutoff = float(false_alarm_cutoff)
        self.in_constraint_weight = float(in_constraint_weight)
        self.lam = 0.0
        self.lam2 = 0.0
        self.ce_tol = float(ce_tol)
        self.ce_constraint_weight = float(ce_constraint_weight)
        self.out_constraint_weight = float(out_constraint_weight)
        self.lr_lam = float(lr_lam)
        self.penalty_mult = float(penalty_mult)
        self.constraint_tol = float(constraint_tol)
        # TODO(synk): update_hyperparameters requires a DataLoader sweep over a
        # model; it is training-loop glue, not part of the forward kernel.

    # ---- tiling --------------------------------------------------------

    def _choose_tile_n(self, n, c, itemsize):
        cap = _vmem_capacity_bytes()                       # 128 MiB v5e/v6e, 64 MiB v7x
        vmem_limit = min(int(cap * 0.85), 100 * 1024 * 1024)
        budget = int(vmem_limit * 0.7)
        # Bytes resident per batch column: 2 pipeline buffers of the (C,T)
        # logits tile, ~3 f32 temporaries (upcast / exp / select), the (4,T)
        # output accumulator, double-buffered int32 targets and ~12 (1,T)
        # f32 row temporaries (masks / lse / sigmoids).
        per_col = c * (2 * itemsize + 3 * 4) + 4 * 4 + 2 * 4 + 12 * 4
        t = max(LANE, (budget // max(per_col, 1)) // LANE * LANE)
        # Cap at ~half the batch so both TensorCores get work on v7x; no other
        # hard cap (bigger tiles amortize the ~0.35us per-grid-step overhead).
        t = min(t, max(LANE, _round_up(_cdiv(n, 2), LANE)))
        return t, vmem_limit
        # TODO(synk): vocab-scale C would need an online-logsumexp split over
        # a second class grid axis; not implemented here.

    # ---- scalar augmented-Lagrangian epilogue (runs in plain JAX) -------

    def _alm_epilogue(self, sums, n_total):
        s_in, s_out, s_ce, n_known = sums[0], sums[1], sums[2], sums[3]
        n_unknown = n_total - n_known
        # NOTE: guarded divisions give a 0 contribution for empty known /
        # unknown sets, where the PyTorch reference (mean over empty) is NaN.
        nk = jnp.maximum(n_known, 1.0)
        nu = jnp.maximum(n_unknown, 1.0)
        energy_loss_in = s_in / nk
        energy_loss_out = s_out / nu
        loss_ce = s_ce / nk

        in_term = energy_loss_in - self.false_alarm_cutoff
        loss_in = jnp.where(
            self.in_constraint_weight * in_term + self.lam >= 0.0,
            in_term * self.lam + self.in_constraint_weight * 0.5 * in_term * in_term,
            -(self.lam * self.lam) * 0.5 / self.in_constraint_weight,
        )

        ce_term = loss_ce - self.ce_tol * self.full_train_loss
        loss_ce_c = jnp.where(
            self.ce_constraint_weight * ce_term + self.lam2 >= 0.0,
            ce_term * self.lam2 + self.ce_constraint_weight * 0.5 * ce_term * ce_term,
            -(self.lam2 * self.lam2) * 0.5 / self.ce_constraint_weight,
        )
        return loss_ce_c + self.out_constraint_weight * energy_loss_out + loss_in

    # ---- forward -------------------------------------------------------

    def forward(self, logits, targets, lr_weight, lr_bias, tile_n=None):
        if logits.ndim != 2:
            raise ValueError(f"Unsupported input shape: {logits.shape}")
        n, c = logits.shape
        itemsize = jnp.dtype(logits.dtype).itemsize

        auto_tile, vmem_limit = self._choose_tile_n(n, c, itemsize)
        if tile_n is None:
            tile_n = auto_tile
        else:
            tile_n = max(LANE, _round_up(int(tile_n), LANE))

        tiles_total = _cdiv(n, tile_n)
        # Outer "parallel" axis: splits work across TensorCores on v7x;
        # harmless sequential iteration on 1-TC v5e/v6e.
        num_splits = 2 if tiles_total >= 2 else 1
        tiles_per_split = _cdiv(tiles_total, num_splits)
        n_pad = num_splits * tiles_per_split * tile_n

        # Lane-dense layout: batch on the 128-lane axis, classes on sublanes.
        # TODO(synk): a real pipeline should have the producer emit [C, N]
        # directly to avoid this extra HBM pass over the logits.
        logits_t = jnp.transpose(logits)                       # [C, N]
        targets = targets.astype(jnp.int32)
        if n_pad != n:
            logits_t = jnp.pad(logits_t, ((0, 0), (0, n_pad - n)))
            targets = jnp.pad(targets, (0, n_pad - n), constant_values=-1)
        targets_row = targets.reshape(1, n_pad)

        params = jnp.stack([
            jnp.asarray(lr_weight, jnp.float32).reshape(()),
            jnp.asarray(lr_bias, jnp.float32).reshape(()),
            jnp.float32(self.eta),
            jnp.float32(0.0),
        ])
        meta = jnp.array([n], dtype=jnp.int32)

        def col_map(cc, ii):
            return (0, cc * tiles_per_split + ii)

        cost = pl.CostEstimate(
            flops=int(8 * n_pad * c + 40 * n_pad),
            transcendentals=int(n_pad * c + 4 * n_pad),
            bytes_accessed=int(n_pad * c * itemsize + n_pad * 4
                               + num_splits * 4 * tile_n * 4),
        )

        partials = pl.pallas_call(
            _energy_margin_kernel,
            out_shape=jax.ShapeDtypeStruct((num_splits, 4, tile_n), jnp.float32),
            grid_spec=pltpu.PrefetchScalarGridSpec(
                num_scalar_prefetch=0,
                grid=(num_splits, tiles_per_split),
                in_specs=[
                    pl.BlockSpec(memory_space=pltpu.MemorySpace.SMEM),  # params
                    pl.BlockSpec(memory_space=pltpu.MemorySpace.SMEM),  # meta (N)
                    pl.BlockSpec((c, tile_n), col_map),                 # logits^T tile
                    pl.BlockSpec((1, tile_n), col_map),                 # targets tile
                ],
                out_specs=pl.BlockSpec((None, 4, tile_n),
                                       lambda cc, ii: (cc, 0, 0)),
            ),
            compiler_params=pltpu.CompilerParams(
                dimension_semantics=("parallel", "arbitrary"),
                vmem_limit_bytes=int(vmem_limit),
            ),
            cost_estimate=cost,
        )(params, meta, logits_t, targets_row)

        # Final cross-core / cross-lane reduction + scalar ALM epilogue.
        sums = jnp.sum(partials, axis=(0, 2))                  # (4,)
        return self._alm_epilogue(sums, jnp.float32(n))

    # ---- pure-JAX reference for correctness checking --------------------

    def forward_reference(self, logits, targets, lr_weight, lr_bias):
        logits = logits.astype(jnp.float32)
        known = targets >= 0
        unknown = ~known
        lse = jax.scipy.special.logsumexp(logits, axis=1)

        def logreg(x):
            return lr_weight * x + lr_bias

        energy_in = jnp.mean(jax.nn.sigmoid(logreg(lse[known])))
        energy_out = jnp.mean(jax.nn.sigmoid(-logreg(lse[unknown] - self.eta)))

        logp = logits - jax.scipy.special.logsumexp(logits, axis=1, keepdims=True)
        ce = -jnp.mean(jnp.take_along_axis(
            logp[known], targets[known][:, None], axis=1))

        in_term = energy_in - self.false_alarm_cutoff
        loss_in = jnp.where(
            self.in_constraint_weight * in_term + self.lam >= 0,
            in_term * self.lam + self.in_constraint_weight / 2 * in_term ** 2,
            -self.lam ** 2 * 0.5 / self.in_constraint_weight)

        ce_term = ce - self.ce_tol * self.full_train_loss
        loss_ce = jnp.where(
            self.ce_constraint_weight * ce_term + self.lam2 >= 0,
            ce_term * self.lam2 + self.ce_constraint_weight / 2 * ce_term ** 2,
            -self.lam2 ** 2 * 0.5 / self.ce_constraint_weight)

        return loss_ce + self.out_constraint_weight * energy_out + loss_in


# --------------------------------- main --------------------------------------

if __name__ == "__main__":
    key = jax.random.PRNGKey(0)
    N, C = 300, 16   # deliberately not a multiple of the tile width

    k_logits, k_tgt = jax.random.split(key)
    logits = jax.random.normal(k_logits, (N, C), dtype=jnp.float32) * 2.0

    # First 200 rows in-distribution with random labels, remaining 100 OOD (-1).
    n_id = 200
    id_labels = jax.random.randint(k_tgt, (n_id,), 0, C, dtype=jnp.int32)
    targets = jnp.concatenate(
        [id_labels, -jnp.ones((N - n_id,), dtype=jnp.int32)])

    # Deterministic logistic-regression (nn.Linear(1,1)) parameters.
    lr_weight = 0.5
    lr_bias = -0.1

    loss_mod = EnergyMarginLossPallas(full_train_loss=0.3)

    # tile_n=128 forces a multi-step inner grid (with padding) to exercise the
    # accumulate path on both outer splits; the auto tile is also checked.
    out_tiled = loss_mod.forward(logits, targets, lr_weight, lr_bias, tile_n=128)
    out_tiled = jax.block_until_ready(out_tiled)
    out_auto = loss_mod.forward(logits, targets, lr_weight, lr_bias)
    out_auto = jax.block_until_ready(out_auto)

    ref = loss_mod.forward_reference(logits, targets, lr_weight, lr_bias)
    assert jnp.allclose(out_tiled, ref, rtol=1e-4, atol=1e-5), (out_tiled, ref)
    assert jnp.allclose(out_auto, ref, rtol=1e-4, atol=1e-5), (out_auto, ref)

    print("KERNEL_OK")
</pallas_src>

<mosaic_0001>
module attributes {stable_mosaic.version = 11 : i64} {
  func.func @_energy_margin_kernel(%arg0: i32, %arg1: i32, %arg2: memref<4xf32, #tpu.memory_space<smem>>, %arg3: memref<1xi32, #tpu.memory_space<smem>>, %arg4: memref<16x128xf32, #tpu.memory_space<vmem>>, %arg5: memref<1x128xi32, #tpu.memory_space<vmem>>, %arg6: memref<1x4x128xf32, #tpu.memory_space<vmem>>) attributes {dimension_semantics = [#tpu.dimension_semantics<parallel>, #tpu.dimension_semantics<arbitrary>], iteration_bounds = array<i64: 2, 2>, scalar_prefetch = 0 : i64, scratch_operands = 0 : i64, tpu.core_type = #tpu.core_type<tc>, window_params = [{transform_indices = @transform_0, window_bounds = array<i64: 4>}, {transform_indices = @transform_1, window_bounds = array<i64: 1>}, {transform_indices = @transform_2, window_bounds = array<i64: 16, 128>}, {transform_indices = @transform_3, window_bounds = array<i64: 1, 128>}, {transform_indices = @transform_4, window_bounds = array<i64: 1, 4, 128>}]} {
    %c0_i32 = arith.constant 0 : i32
    %0 = arith.cmpi eq, %arg1, %c0_i32 : i32
    %1 = arith.extui %0 : i1 to i32
    %c0_i32_0 = arith.constant 0 : i32
    %2 = arith.cmpi ne, %1, %c0_i32_0 : i32
    scf.if %2 {
      %cst_37 = arith.constant 0.000000e+00 : f32
      %93 = vector.broadcast %cst_37 : f32 to vector<4x128xf32>
      %c0_38 = arith.constant 0 : index
      %c0_39 = arith.constant 0 : index
      %c0_40 = arith.constant 0 : index
      %94 = vector.load %arg6[%c0_38, %c0_39, %c0_40] : memref<1x4x128xf32, #tpu.memory_space<vmem>>, vector<1x4x128xf32>
      %95 = vector.shape_cast %94 : vector<1x4x128xf32> to vector<4x128xf32>
      %96 = vector.shape_cast %93 : vector<4x128xf32> to vector<1x4x128xf32>
      tpu.vector_store %arg6[%c0_38, %c0_39, %c0_40], %96 {strides = array<i32>} : memref<1x4x128xf32, #tpu.memory_space<vmem>>, vector<1x4x128xf32>,
    } else {
    }
    %c0 = arith.constant 0 : index
    %3 = memref.load %arg2[%c0] : memref<4xf32, #tpu.memory_space<smem>>
    %c1 = arith.constant 1 : index
    %4 = memref.load %arg2[%c1] : memref<4xf32, #tpu.memory_space<smem>>
    %c2 = arith.constant 2 : index
    %5 = memref.load %arg2[%c2] : memref<4xf32, #tpu.memory_space<smem>>
    %c0_1 = arith.constant 0 : index
    %6 = memref.load %arg3[%c0_1] : memref<1xi32, #tpu.memory_space<smem>>
    %c0_2 = arith.constant 0 : index
    %c0_3 = arith.constant 0 : index
    %7 = vector.load %arg4[%c0_2, %c0_3] : memref<16x128xf32, #tpu.memory_space<vmem>>, vector<16x128xf32>
    %c0_4 = arith.constant 0 : index
    %c0_5 = arith.constant 0 : index
    %8 = vector.load %arg5[%c0_4, %c0_5] : memref<1x128xi32, #tpu.memory_space<vmem>>, vector<1x128xi32>
    %c2_i32 = arith.constant 2 : i32
    %9 = arith.muli %arg0, %c2_i32 : i32
    %10 = arith.addi %9, %arg1 : i32
    %c128_i32 = arith.constant 128 : i32
    %11 = arith.muli %10, %c128_i32 : i32
    %12 = tpu.iota {dimensions = array<i32: 1>} : vector<1x128xi32>
    %13 = vector.broadcast %11 : i32 to vector<1x128xi32>
    %14 = arith.addi %13, %12 : vector<1x128xi32>
    %15 = vector.broadcast %6 : i32 to vector<1x128xi32>
    %16 = arith.cmpi slt, %14, %15 : vector<1x128xi32>
    %c0_i32_6 = arith.constant 0 : i32
    %17 = vector.broadcast %c0_i32_6 : i32 to vector<1x128xi32>
    %18 = arith.cmpi sge, %8, %17 : vector<1x128xi32>
    %19 = arith.andi %16, %18 : vector<1x128xi1>
    %20 = arith.extui %19 : vector<1x128xi1> to vector<1x128xi32>
    %21 = arith.sitofp %20 : vector<1x128xi32> to vector<1x128xf32>
    %c0_i32_7 = arith.constant 0 : i32
    %22 = vector.broadcast %c0_i32_7 : i32 to vector<1x128xi32>
    %23 = arith.cmpi slt, %8, %22 : vector<1x128xi32>
    %24 = arith.andi %16, %23 : vector<1x128xi1>
    %25 = arith.extui %24 : vector<1x128xi1> to vector<1x128xi32>
    %26 = arith.sitofp %25 : vector<1x128xi32> to vector<1x128xf32>
    %cst = arith.constant dense<0xFF800000> : vector<128xf32>
    %27 = vector.multi_reduction <maximumf>, %7, %cst [0] : vector<16x128xf32> to vector<128xf32>
    %28 = vector.shape_cast %27 : vector<128xf32> to vector<1x128xf32>
    %29 = vector.broadcast %28 : vector<1x128xf32> to vector<16x128xf32>
    %30 = arith.subf %7, %29 : vector<16x128xf32>
    %31 = math.exp %30 : vector<16x128xf32>
    %cst_8 = arith.constant dense<0.000000e+00> : vector<128xf32>
    %32 = vector.multi_reduction <add>, %31, %cst_8 [0] : vector<16x128xf32> to vector<128xf32>
    %33 = vector.shape_cast %32 : vector<128xf32> to vector<1x128xf32>
    %34 = math.log %33 : vector<1x128xf32>
    %35 = arith.addf %28, %34 : vector<1x128xf32>
    %36 = tpu.iota {dimensions = array<i32: 0>} : vector<16x128xi32>
    %37 = vector.broadcast %8 : vector<1x128xi32> to vector<16x128xi32>
    %38 = arith.cmpi eq, %36, %37 : vector<16x128xi32>
    %cst_9 = arith.constant 0.000000e+00 : f32
    %39 = vector.broadcast %cst_9 : f32 to vector<16x128xf32>
    %40 = arith.select %38, %30, %39 : vector<16x128xi1>, vector<16x128xf32>
    %cst_10 = arith.constant dense<0.000000e+00> : vector<128xf32>
    %41 = vector.multi_reduction <add>, %40, %cst_10 [0] : vector<16x128xf32> to vector<128xf32>
    %42 = vector.shape_cast %41 : vector<128xf32> to vector<1x128xf32>
    %43 = arith.subf %34, %42 : vector<1x128xf32>
    %44 = vector.broadcast %3 : f32 to vector<1x128xf32>
    %45 = arith.mulf %44, %35 : vector<1x128xf32>
    %46 = vector.broadcast %4 : f32 to vector<1x128xf32>
    %47 = arith.addf %45, %46 : vector<1x128xf32>
    %48 = arith.negf %47 : vector<1x128xf32>
    %49 = math.exp %48 : vector<1x128xf32>
    %cst_11 = arith.constant 1.000000e+00 : f32
    %50 = vector.broadcast %cst_11 : f32 to vector<1x128xf32>
    %51 = arith.addf %50, %49 : vector<1x128xf32>
    %52 = arith.divf %50, %51 : vector<1x128xf32>
    %53 = vector.broadcast %5 : f32 to vector<1x128xf32>
    %54 = arith.subf %35, %53 : vector<1x128xf32>
    %55 = vector.broadcast %3 : f32 to vector<1x128xf32>
    %56 = arith.mulf %55, %54 : vector<1x128xf32>
    %57 = vector.broadcast %4 : f32 to vector<1x128xf32>
    %58 = arith.addf %56, %57 : vector<1x128xf32>
    %cst_12 = arith.constant 0.000000e+00 : f32
    %59 = vector.broadcast %cst_12 : f32 to vector<1x128xf32>
    %60 = arith.subf %59, %58 : vector<1x128xf32>
    %61 = arith.negf %60 : vector<1x128xf32>
    %62 = math.exp %61 : vector<1x128xf32>
    %cst_13 = arith.constant 1.000000e+00 : f32
    %63 = vector.broadcast %cst_13 : f32 to vector<1x128xf32>
    %64 = arith.addf %63, %62 : vector<1x128xf32>
    %65 = arith.divf %63, %64 : vector<1x128xf32>
    %c0_14 = arith.constant 0 : index
    %c0_15 = arith.constant 0 : index
    %c0_16 = arith.constant 0 : index
    %66 = vector.load %arg6[%c0_14, %c0_15, %c0_16] : memref<1x4x128xf32, #tpu.memory_space<vmem>>, vector<1x1x128xf32>
    %67 = vector.shape_cast %66 : vector<1x1x128xf32> to vector<1x128xf32>
    %68 = arith.mulf %21, %52 : vector<1x128xf32>
    %69 = arith.addf %67, %68 : vector<1x128xf32>
    %c0_17 = arith.constant 0 : index
    %c0_18 = arith.constant 0 : index
    %c0_19 = arith.constant 0 : index
    %70 = vector.load %arg6[%c0_17, %c0_18, %c0_19] : memref<1x4x128xf32, #tpu.memory_space<vmem>>, vector<1x1x128xf32>
    %71 = vector.shape_cast %70 : vector<1x1x128xf32> to vector<1x128xf32>
    %72 = vector.shape_cast %69 : vector<1x128xf32> to vector<1x1x128xf32>
    tpu.vector_store %arg6[%c0_17, %c0_18, %c0_19], %72 {strides = array<i32>} : memref<1x4x128xf32, #tpu.memory_space<vmem>>, vector<1x1x128xf32>,
    %c0_20 = arith.constant 0 : index
    %c1_21 = arith.constant 1 : index
    %c0_22 = arith.constant 0 : index
    %73 = vector.load %arg6[%c0_20, %c1_21, %c0_22] : memref<1x4x128xf32, #tpu.memory_space<vmem>>, vector<1x1x128xf32>
    %74 = vector.shape_cast %73 : vector<1x1x128xf32> to vector<1x128xf32>
    %75 = arith.mulf %26, %65 : vector<1x128xf32>
    %76 = arith.addf %74, %75 : vector<1x128xf32>
    %c0_23 = arith.constant 0 : index
    %c1_24 = arith.constant 1 : index
    %c0_25 = arith.constant 0 : index
    %77 = vector.load %arg6[%c0_23, %c1_24, %c0_25] : memref<1x4x128xf32, #tpu.memory_space<vmem>>, vector<1x1x128xf32>
    %78 = vector.shape_cast %77 : vector<1x1x128xf32> to vector<1x128xf32>
    %79 = vector.shape_cast %76 : vector<1x128xf32> to vector<1x1x128xf32>
    tpu.vector_store %arg6[%c0_23, %c1_24, %c0_25], %79 {strides = array<i32>} : memref<1x4x128xf32, #tpu.memory_space<vmem>>, vector<1x1x128xf32>,
    %c0_26 = arith.constant 0 : index
    %c2_27 = arith.constant 2 : index
    %c0_28 = arith.constant 0 : index
    %80 = vector.load %arg6[%c0_26, %c2_27, %c0_28] : memref<1x4x128xf32, #tpu.memory_space<vmem>>, vector<1x1x128xf32>
    %81 = vector.shape_cast %80 : vector<1x1x128xf32> to vector<1x128xf32>
    %82 = arith.mulf %21, %43 : vector<1x128xf32>
    %83 = arith.addf %81, %82 : vector<1x128xf32>
    %c0_29 = arith.constant 0 : index
    %c2_30 = arith.constant 2 : index
    %c0_31 = arith.constant 0 : index
    %84 = vector.load %arg6[%c0_29, %c2_30, %c0_31] : memref<1x4x128xf32, #tpu.memory_space<vmem>>, vector<1x1x128xf32>
    %85 = vector.shape_cast %84 : vector<1x1x128xf32> to vector<1x128xf32>
    %86 = vector.shape_cast %83 : vector<1x128xf32> to vector<1x1x128xf32>
    tpu.vector_store %arg6[%c0_29, %c2_30, %c0_31], %86 {strides = array<i32>} : memref<1x4x128xf32, #tpu.memory_space<vmem>>, vector<1x1x128xf32>,
    %c0_32 = arith.constant 0 : index
    %c3 = arith.constant 3 : index
    %c0_33 = arith.constant 0 : index
    %87 = vector.load %arg6[%c0_32, %c3, %c0_33] : memref<1x4x128xf32, #tpu.memory_space<vmem>>, vector<1x1x128xf32>
    %88 = vector.shape_cast %87 : vector<1x1x128xf32> to vector<1x128xf32>
    %89 = arith.addf %88, %21 : vector<1x128xf32>
    %c0_34 = arith.constant 0 : index
    %c3_35 = arith.constant 3 : index
    %c0_36 = arith.constant 0 : index
    %90 = vector.load %arg6[%c0_34, %c3_35, %c0_36] : memref<1x4x128xf32, #tpu.memory_space<vmem>>, vector<1x1x128xf32>
    %91 = vector.shape_cast %90 : vector<1x1x128xf32> to vector<1x128xf32>
    %92 = vector.shape_cast %89 : vector<1x128xf32> to vector<1x1x128xf32>
    tpu.vector_store %arg6[%c0_34, %c3_35, %c0_36], %92 {strides = array<i32>} : memref<1x4x128xf32, #tpu.memory_space<vmem>>, vector<1x1x128xf32>,
    return
  }
  func.func @transform_0(%arg0: i32, %arg1: i32) -> i32 {
    %c0_i32 = arith.constant 0 : i32
    %c0_i32_0 = arith.constant 0 : i32
    return %c0_i32 : i32
  }
  func.func @transform_1(%arg0: i32, %arg1: i32) -> i32 {
    %c0_i32 = arith.constant 0 : i32
    %c0_i32_0 = arith.constant 0 : i32
    return %c0_i32 : i32
  }
  func.func @transform_2(%arg0: i32, %arg1: i32) -> (i32, i32) {
    %c2_i32 = arith.constant 2 : i32
    %0 = arith.muli %arg0, %c2_i32 : i32
    %1 = arith.addi %0, %arg1 : i32
    %c0_i32 = arith.constant 0 : i32
    %c0_i32_0 = arith.constant 0 : i32
    return %c0_i32, %1 : i32, i32
  }
  func.func @transform_3(%arg0: i32, %arg1: i32) -> (i32, i32) {
    %c2_i32 = arith.constant 2 : i32
    %0 = arith.muli %arg0, %c2_i32 : i32
    %1 = arith.addi %0, %arg1 : i32
    %c0_i32 = arith.constant 0 : i32
    %c0_i32_0 = arith.constant 0 : i32
    return %c0_i32, %1 : i32, i32
  }
  func.func @transform_4(%arg0: i32, %arg1: i32) -> (i32, i32, i32) {
    %c0_i32 = arith.constant 0 : i32
    %c0_i32_0 = arith.constant 0 : i32
    %c0_i32_1 = arith.constant 0 : i32
    return %arg0, %c0_i32, %c0_i32_0 : i32, i32, i32
  }
}

</mosaic_0001>

<bundles_post_ra>
// kernel: tpu_custom_call.1
= control target key start
LH: loop header
LB: loop body
LE: loop exit
PB: predicated region body
PF: predicated region fallthrough
CT: control target
= control target key end

     0   :  { %s1226_s0 = inlined_call_operand.vmem [shape: f32[4], index: 0, kind: input, shape index: {}]   ;;  %s1227_s1 = inlined_call_operand.<no memory space> [shape: s32[1], index: 1, kind: input, shape index: {}]   ;;  %s1228_s2 = inlined_call_operand.hbm [shape: f32[16,512], index: 2, kind: input, shape index: {}]   ;;  %s1229_s3 = inlined_call_operand.hbm [shape: s32[1,512], index: 3, kind: input, shape index: {}]   ;;  %s1230_s4 = inlined_call_operand.hbm [shape: f32[2,4,128], index: 4, kind: output, shape index: {}]  }
   0x1   :  { %1240 = sst [smem:[#allocation21_spill]] %s1226_s0 }
   0x2   :  { %1241 = sst [smem:[#allocation22_spill]] %s1228_s2 }
   0x3   :  { %1242 = sst [smem:[#allocation23_spill]] %s1230_s4 }
   0x4   :  { %9 = sst [smem:[#allocation2]] %s1227_s1 }
   0x5   :  { %10 = vsyncpa [#allocation6], 0 }
   0x6   :  { %11 = vsyncpa [#allocation4], 0 }
   0x7   :  { %13 = vsyncpa [#allocation4 + $0x1], 0 }
   0x8   :  { %14 = vsyncpa [#allocation9], 0 }
   0x9   :  { %16 = vsyncpa [#allocation9 + $0x1], 0 }
   0xa   :  { %17 = vsyncpa [#allocation5], 0 }
   0xb   :  { %19 = vsyncpa [#allocation5 + $0x1], 0  ;;  %s966_s17 = smov 0   ;;  %s968_s18 = smov 0  }
   0xc   :  { %s970_s19 = smov 0   ;;  %s972_s20 = smov 0  }
   0xd   :  { %s974_s21 = smov 0   ;;  %s976_s22 = smov 0  }
   0xe   :  { %s978_s1 = smov 0   ;;  %s980_s23 = smov 0  }
   0xf   :  { %s982_s24 = smov 0   ;;  %s984_s25 = smov 0  }
  0x10   :  { %s986_s26 = smov 0  }
  0x11 LB: > { %1243 = sst [smem:[#allocation15_spill]] %s890_s17  ;;  %s557_s27 = sadd.s32 4294967295, %s930_s26   ;;  %s930_s26 = sphi %s986_s26, %s25_s26   ;;  %s926_s25 = sphi %s984_s25, %s1278_s25   ;;  %s922_s24 = sphi %s982_s24, %s1277_s24   ;;  %s918_s23 = sphi %s980_s23, %s1276_s23   ;;  %s914_s1 = sphi %s978_s1, %s1268_s1   ;;  %s910_s22 = sphi %s976_s22, %s1275_s22   ;;  %s906_s21 = sphi %s974_s21, %s1274_s21   ;;  %s902_s20 = sphi %s972_s20, %s1273_s20   ;;  %s898_s19 = sphi %s970_s19, %s1272_s19   ;;  %s894_s18 = sphi %s968_s18, %s1271_s18   ;;  %s890_s17 = sphi %s966_s17, %s1270_s17  }
  0x12   : > { %1244 = sst [smem:[#allocation16_spill]] %s922_s24  ;;  %s558_s28 = sadd.s32 4294967294, %s930_s26  }
  0x13   : > { %1245 = sst [smem:[#allocation17_spill]] %s930_s26  ;;  %p97_p0 = scmp.ne.s32.totalorder %s910_s22, %s906_s21 }
  0x14   : > { %p98_p1 = scmp.eq.s32.totalorder %s930_s26, 0  ;;  %p103_p2 = scmp.ne.s32.totalorder %s906_s21, %s902_s20 }
  0x15   : > { %p1026_p3 = scmp.eq.s32.totalorder %s557_s27, 0  ;;  %p156_p5 = scmp.ne.s32.totalorder %s898_s19, %s894_s18 }
  0x16   : > { %p1031_p4 = por %p98_p1, %p97_p0  ;;  %p157_p7 = scmp.eq.s32.totalorder %s557_s27, 3 }
  0x17   : > { %p1039_p6 = por %p1026_p3, %p103_p2  ;;  %p162_p8 = scmp.ne.s32.totalorder %s894_s18, %s890_s17 }
  0x18   : > { %p163_p9 = scmp.eq.s32.totalorder %s558_s28, 3  ;;  %p1045_p10 = por %p157_p7, %p156_p5 }
  0x19   : > { %p563_p11 = scmp.ge.s32.totalorder %s930_s26, 1  ;;  %p170_p13 = scmp.lt.s32.totalorder %s930_s26, 5 }
  0x1a   : > { %s1249_s8 = scalar_select %p1045_p10, 1, 0 }
  0x1b   : > { %p1050_p12 = por %p163_p9, %p162_p8  ;;  %s1253_s0 = sld [smem:[#allocation21_spill]] }
  0x1c   : > { %1250 = sst [smem:[#allocation18_spill]] %s1249_s8  ;;  %p1058_p0 = pnand %p563_p11, %p170_p13 }
  0x1d   : > { %s1251_s9 = scalar_select %p1050_p12, 1, 0 }
  0x1e   : > { %p597_p1 = pneg %p1058_p0  ;;  %p613_p2 = scmp.lt.s32.totalorder %s930_s26, 4 }
  0x1f   : > { %1252 = sst [smem:[#allocation19_spill]] %s1251_s9  ;;  %s932_s15 = smov [#allocation3]  }
  0x20   : > { %p598_p5 = pnand %p597_p1, %p1026_p3  ;;  %p1069_p7 = pnand %p613_p2, %p1031_p4 }
  0x21   : > { %s182_s12 = sshll.u32 %s1253_s0, 4  ;;  %s34_s16 = sadd.s32 1, %s922_s24  ;;  %s183_s12 = int_to_ptr.vmem [resolvable:$true] %s182_s12 }
  0x22   : > { %600 = dma.vmem_to_smem (!%p598_p5), %s183_s12, 16, %s932_s15, [#allocation6]  }
  0x23   : > { %s37_s20 = sadd.s32 1, %s926_s25  ;;  %p35_p8 = scmp.ge.s32.totalorder %s34_s16, 2 }
  0x24   : > { %s559_s27 = sshll.u32 %s926_s25, 1  ;;  %s1080_s10 = sand.u32 1, %s910_s22  }
  0x25   : > { %s1077_s28 = sadd.s32 %s922_s24, %s559_s27  ;;  %s1280_s16 = smov (%p35_p8, %s34_s16), 0 }
  0x26   : > { %s1282_s20 = smov (!%p35_p8, %s37_s20), %s926_s25  ;;  %s566_s6 = sshll.u32 %s1080_s10, 4 }
  0x27   : > { %p39_p4 = scmp.ge.s32.totalorder %s1282_s20, 2  ;;  %s568_s11 = sshll.u32 %s1077_s28, 3 }
  0x28   : > { %s200_s12 = scalar_lea.vmem [#allocation7], %s566_s6  ;;  %s1257_s2 = sld [smem:[#allocation22_spill]] }
  0x29   : > { %s209_s15 = sshll.u32 %s200_s12, 4  ;;  %s1284_s20 = smov (%p39_p4, %s1282_s20), 0  ;;  %s210_s15 = int_to_ptr.vmem [resolvable:$true] %s209_s15 }
  0x2a   : > { %1256 = sst [smem:[#allocation20_spill]] %s1284_s20  ;;  %s560_s0 = sshll.u32 %s1284_s20, 1 }
  0x2b   : > { %s143_s24 = ssub.s32 %s926_s25, %s1284_s20  ;;  %s86_s9 = sadd.s32 %s560_s0, %s1280_s16 }
  0x2c   : > { %p144_p9 = scmp.eq.s32.totalorder %s143_s24, 0  ;;  %s87_s17 = ssub.s32 %s1077_s28, %s86_s9 }
  0x2d   : > { %p88_p11 = scmp.eq.s32.totalorder %s87_s17, 0  ;;  %s1258_s6 = sadd.s32 1, %s898_s19 }
  0x2e   : > { %s206_s5 = scalar_lea.hbm %s1257_s2, %s568_s11  ;;  %s1259_s29 = sadd.s32 1, %s910_s22 }
  0x2f   : > { %s207_s26 = sshll.u32 %s206_s5, 4  ;;  %s197_s11 = scalar_lea.sflag [#allocation4], %s1080_s10  ;;  %s208_s26 = int_to_ptr.hbm [resolvable:$true] %s207_s26 }
  0x30   : > { %s1100_s12 = scalar_select %p144_p9, %s898_s19, %s1258_s6  }
  0x31   : > { %s1105_s27 = scalar_select %p88_p11, %s910_s22, %s1259_s29  }
  0x32   : > { %s933_s2 = smov 512   ;;  %s934_s8 = smov 128  }
  0x33   : > { %s935_s4 = smov 8   ;;  %s227_s5 = scalar_lea.hbm %s1229_s3, %s1077_s28 }
  0x34   : > { %604 = dma.hbm_to_vmem [thread:$0]  (!%p1069_p7), %s208_s26, 256, %s210_s15, %s197_s11, %s933_s2, %s934_s8, %s935_s4  }
  0x35   : > { %s229_s9 = sshll.u32 %s227_s5, 4  ;;  %s222_s17 = scalar_lea.vmem [#allocation8], %s1080_s10  ;;  %s230_s9 = int_to_ptr.hbm [resolvable:$true] %s229_s9 }
  0x36   : > { %s231_s20 = sshll.u32 %s222_s17, 4  ;;  %s220_s6 = scalar_lea.sflag [#allocation9], %s1080_s10  ;;  %s232_s20 = int_to_ptr.vmem [resolvable:$true] %s231_s20 }
  0x37   : > { %607 = dma.hbm_to_vmem [thread:$0]  (!%p1069_p7), %s230_s9, 16, %s232_s20, %s220_s6  }
  0x38   : > { %240 = sbr.rel (%p1058_p0) target bundleno = 174 (0xae), region = 36 }
  0x3d   : > { %873 = dma.done.wait (%p1026_p3), [#allocation6], 16  }
  0x3e   : > { %875 = vsyncadd (%p1026_p3), [#allocation6], 4294967280  ;;  %s1125_s2 = sand.u32 1, %s906_s21  }
  0x3f   : > { %s572_s4 = sshll.u32 %s1125_s2, 4  ;;  %s248_s26 = scalar_lea.sflag [#allocation4], %s1125_s2 }
  0x40   : > { %s251_s8 = scalar_lea.vmem [#allocation7], %s572_s4 }
  0x41   : > { %877 = dma.done.wait (%p1039_p6), %s248_s26, 256  }
  0x42   : > { %879 = vsyncadd (%p1039_p6), %s248_s26, 4294967040  ;;  %s258_s13 = scalar_lea.sflag [#allocation9], %s1125_s2  ;;  %s260_s30 = scalar_lea.vmem [#allocation8], %s1125_s2 }
  0x43   : > { %881 = dma.done.wait (%p1039_p6), %s258_s13, 16  }
  0x44   : > { %883 = vsyncadd (%p1039_p6), %s258_s13, 4294967280 }
  0x45   : > { %266 = sfence }
  0x46   : > { %s288_s14 = sand.u32 1, %s894_s18   ;;  %p574_p3 = scmp.ne.s32.totalorder %s914_s1, 0 }
  0x47   : > { %s573_s20 = sshll.u32 %s288_s14, 2 }
  0x48   : > { %s1142_s28 = scalar_lea.vmem [#allocation10], %s573_s20  ;;  %298 = sbr.rel (%p574_p3) target bundleno = 79 (0x4f), region = 52 }
  0x4d   : > { %v936_v0 = vmov 0.0  }
  0x4e   : > { %299 = vst [vmem:[%s1142_s28] sm:$0xf] %v936_v0 }
  0x4f PF: > { %v304_v1 = vld [vmem:[%s251_s8] sm:$0xff]  ;;  %v305_v2 = vld [vmem:[%s251_s8 + $0x8] sm:$0xff]  ;;  %v310_v14 = vlaneseq  ;;  %s577_s7 = sshll.u32 %s918_s23, 1  ;;  %s303_s15 = sld [smem:[#allocation2]]  ;;  %v937_v49 = vmov 0.0  }
  0x50   : > { %v324_v3 = vmax.f32 %v304_v1, %v305_v2  ;;  %v710_v22 = vld [vmem:[%s260_s30] ss:$0 sm:$0xff]  ;;  %s308_s10 = sadd.s32 %s914_s1, %s577_s7  ;;  %s576_s11 = sld [smem:[#allocation3 + $0x2]] }
  0x51   : > { %v348_v18 = vshrl.u32 %v310_v14, 7  ;;  %s578_s29 = sshll.u32 %s308_s10, 7  ;;  %v311_v26 = vand.u32 127, %v310_v14  ;;  %s300_s0 = sld [smem:[#allocation3]]  ;;  %v1152_v34 = vld [vmem:[%s260_s30] sm:$0x1] }
  0x52   : > { %v325_v4 = vrot.slane %v324_v3, 4  ;;  %v312_v30 = vstv %s578_s29  ;;  %s575_s1 = sld [smem:[#allocation3 + $0x1]]  ;;  %vm316_vm3 = vcmp.ge.s32.totalorder %v1152_v34, 0  ;;  %vm320_vm7 = vcmp.lt.s32.totalorder %v1152_v34, 0  ;;  %s584_s24 = sshll.u32 %s918_s23, 2 }
  0x53   : > { %v349_v21 = vadd.s32 8, %v348_v18  ;;  %vm351_vm0 = vcmp.eq.s32.totalorder %v348_v18, %v710_v22  ;;  %v313_v33 = vadd.s32 %v312_v30, %v311_v26  ;;  %s1262_s23 = sld [smem:[#allocation23_spill]]  ;;  %s438_s4 = sshll.u32 %s1142_s28, 4  ;;  %s439_s4 = int_to_ptr.vmem [resolvable:$true] %s438_s4 }
  0x54   : > { %v326_v5 = vmax.f32 %v324_v3, %v325_v4  ;;  %s426_s8 = scalar_lea.sflag [#allocation5], %s288_s14 }
  0x55   : > { %vm352_vm1 = vcmp.eq.s32.totalorder %v349_v21, %v710_v22  ;;  %v314_v35 = vstv %s303_s15  ;;  %v418_v58 = vld [vmem:[%s1142_s28 + $0x2] sm:$0x1]  ;;  %v422_v59 = vld [vmem:[%s1142_s28 + $0x3] sm:$0x1] }
  0x56   : > { %v327_v6 = vrot.slane %v326_v5, 2  ;;  %vm1154_vm2 = vcmp.lt.s32.totalorder %v313_v33, %v314_v35  ;;  %v386_v42 = vstv %s576_s11 }
  0x57   : > { %vm317_vm4 = vmand %vm1154_vm2, %vm316_vm3  ;;  %v363_v45 = vstv %s300_s0 }
  0x58   : > { %v328_v7 = vmax.f32 %v326_v5, %v327_v6  ;;  %v579_v50 = vsel %vm317_vm4, 1.0, %v937_v49  ;;  %v365_v51 = vstv %s575_s1  ;;  %vm321_vm12 = vmand %vm1154_vm2, %vm320_vm7 }
  0x59   : > { %v423_v62 = vadd.f32 %v579_v50, %v422_v59  ;;  %s1263_s6 = smov %s1262_s23  ;;  %s436_s17 = scalar_lea.hbm %s1262_s23, %s584_s24 }
  0x5a   : > { %v329_v8 = vrot.slane %v328_v7, 1  ;;  %s440_s26 = sshll.u32 %s436_s17, 4  ;;  %s820_s10 = scalar_lea.hbm %s1263_s6, 8  ;;  %s441_s26 = int_to_ptr.hbm [resolvable:$true] %s440_s26 }
  0x5b   : > { %424 = vst [vmem:[%s1142_s28 + $0x3] sm:$0x1] %v423_v62  ;;  %s814_s13 = sshra.s32 %s441_s26, 4  ;;  %s815_s13 = int_to_ptr.hbm [resolvable:$true] %s814_s13 }
  0x5c   : > { %v330_v9 = vmax.f32 %v328_v7, %v329_v8  ;;  %s816_s30 = scalar_lea.hbm %s815_s13, 4  ;;  %p821_p1 = scmp.lt.s32.totalorder %s815_s13, %s1263_s6 }
  0x5d   : > { %p817_p6 = scmp.ne.s32.totalorder %s815_s13, %s816_s30  ;;  %p822_p2 = scmp.lt.s32.totalorder %s820_s10, %s816_s30 }
  0x5e   : > { %v331_v10 = vsub.f32 %v304_v1, %v330_v9  ;;  %v332_v11 = vsub.f32 %v305_v2, %v330_v9 }
  0x5f   : > { %p818_p13 = pnand %p817_p6, %p1045_p10  ;;  %p823_p5 = por %p822_p2, %p821_p1 }
  0x60   : > { %v333_v12 = vmul.f32 1.442695, %v331_v10  ;;  %v335_v13 = vmul.f32 1.442695, %v332_v11  ;;  %v353_v28 = vsel %vm351_vm0, %v331_v10, 0.0  ;;  %v354_v29 = vsel %vm352_vm1, %v332_v11, 0.0 }
  0x61   : > { %v355_v31 = vadd.f32 %v354_v29, %v353_v28  ;;  %v414_v28 = vld [vmem:[%s1142_s28 + $0x1] sm:$0x1]  ;;  %p819_p0 = pneg %p818_p13 }
  0x62   : > { %711 = vpow2.f32 %v333_v12 }
  0x63   : > { %713 = vpow2.f32 %v335_v13  ;;  %v356_v32 = vrot.slane %v355_v31, 4  ;;  %p824_p7 = pnand %p823_p5, %p819_p0 }
  0x65   : > { %v357_v36 = vadd.f32 %v356_v32, %v355_v31 }
  0x67   : > { %v358_v37 = vrot.slane %v357_v36, 2 }
  0x68   : > { %v712_v15 = vpop.eup %711 }
  0x69   : > { %v714_v16 = vpop.eup %713  ;;  %v359_v41 = vadd.f32 %v358_v37, %v357_v36 }
  0x6a   : > { %v337_v17 = vadd.f32 %v714_v16, %v712_v15 }
  0x6b   : > { %v360_v44 = vrot.slane %v359_v41, 1 }
  0x6c   : > { %v338_v19 = vrot.slane %v337_v17, 4 }
  0x6d   : > { %v361_v48 = vadd.f32 %v360_v44, %v359_v41 }
  0x6e   : > { %v339_v20 = vadd.f32 %v338_v19, %v337_v17 }
  0x70   : > { %v340_v23 = vrot.slane %v339_v20, 2 }
  0x72   : > { %v341_v24 = vadd.f32 %v340_v23, %v339_v20  ;;  %v410_v20 = vld [vmem:[%s1142_s28] sm:$0x1] }
  0x74   : > { %v342_v25 = vrot.slane %v341_v24, 1 }
  0x76   : > { %v343_v27 = vadd.f32 %v342_v25, %v341_v24  ;;  %v580_v24 = vsel %vm321_vm12, 1.0, %v937_v49 }
  0x78   : > { %715 = vlog2.f32 %v343_v27 }
  0x7e   : > { %v716_v38 = vpop.eup %715 }
  0x7f   : > { %v345_v40 = vmul.f32 0.6931472, %v716_v38 }
  0x81   : > { %v346_v43 = vadd.f32 %v345_v40, %v330_v9  ;;  %v362_v54 = vsub.f32 %v345_v40, %v361_v48 }
  0x83   : > { %v364_v46 = vmul.f32 %v363_v45, %v346_v43  ;;  %v387_v47 = vsub.f32 %v346_v43, %v386_v42  ;;  %v419_v57 = vmul.f32 %v579_v50, %v362_v54 }
  0x85   : > { %v366_v52 = vadd.f32 %v365_v51, %v364_v46  ;;  %v388_v53 = vmul.f32 %v387_v47, %v363_v45  ;;  %v420_v61 = vadd.f32 %v419_v57, %v418_v58 }
  0x87   : > { %v581_v55 = vmul.f32 -1.442695, %v366_v52  ;;  %v389_v56 = vadd.f32 %v388_v53, %v365_v51  ;;  %421 = vst [vmem:[%s1142_s28 + $0x2] sm:$0x1] %v420_v61 }
  0x89   : > { %717 = vpow2.f32 %v581_v55  ;;  %v390_v60 = vsub.f32 0.0, %v389_v56 }
  0x8b   : > { %v582_v63 = vmul.f32 -1.442695, %v390_v60 }
  0x8d   : > { %719 = vpow2.f32 %v582_v63 }
  0x8f   : > { %v718_v0 = vpop.eup %717 }
  0x90   : > { %v370_v1 = vadd.f32 1.0, %v718_v0 }
  0x92   : > { %721 = vrcp.f32 %v370_v1  ;;  %v380_v6 = vand.u32 2147483647, %v370_v1  ;;  %v382_v7 = vand.u32 2147483648, %v370_v1  ;;  %vm376_vm5 = vweird.f32 %v370_v1 }
  0x93   : > { %v720_v2 = vpop.eup %719 }
  0x94   : > { %v394_v3 = vadd.f32 1.0, %v720_v2  ;;  %vm381_vm9 = vcmp.eq.f32.partialorder %v380_v6, 8.507059e+37  ;;  %v383_v12 = vor.u32 1.1754944e-38, %v382_v7 }
  0x96   : > { %723 = vrcp.f32 %v394_v3  ;;  %vm400_vm10 = vweird.f32 %v394_v3  ;;  %v406_v13 = vand.u32 2147483648, %v394_v3  ;;  %v404_v16 = vand.u32 2147483647, %v394_v3 }
  0x98   : > { %v722_v4 = vpop.eup %721  ;;  %v407_v21 = vor.u32 1.1754944e-38, %v406_v13  ;;  %vm405_vm14 = vcmp.eq.f32.partialorder %v404_v16, 8.507059e+37 }
  0x99   : > { %v372_v5 = vmul.f32 %v722_v4, %v370_v1  ;;  %vm377_vm6 = vweird.f32 %v722_v4 }
  0x9a   : > { %vm378_vm8 = vmor %vm376_vm5, %vm377_vm6 }
  0x9b   : > { %v373_v8 = vsub.f32 1.0, %v372_v5 }
  0x9c   : > { %v724_v9 = vpop.eup %723 }
  0x9d   : > { %v374_v10 = vmul.f32 %v722_v4, %v373_v8  ;;  %v396_v11 = vmul.f32 %v724_v9, %v394_v3  ;;  %vm401_vm11 = vweird.f32 %v724_v9 }
  0x9e   : > { %vm402_vm13 = vmor %vm400_vm10, %vm401_vm11 }
  0x9f   : > { %v375_v14 = vadd.f32 %v722_v4, %v374_v10  ;;  %v397_v15 = vsub.f32 1.0, %v396_v11 }
  0xa1   : > { %v379_v17 = vsel %vm378_vm8, %v722_v4, %v375_v14  ;;  %v398_v18 = vmul.f32 %v724_v9, %v397_v15 }
  0xa2   : > { %v384_v19 = vsel %vm381_vm9, %v383_v12, %v379_v17 }
  0xa3   : > { %v411_v22 = vmul.f32 %v579_v50, %v384_v19  ;;  %v399_v23 = vadd.f32 %v724_v9, %v398_v18 }
  0xa5   : > { %v412_v25 = vadd.f32 %v411_v22, %v410_v20  ;;  %v403_v26 = vsel %vm402_vm13, %v724_v9, %v399_v23 }
  0xa6   : > { %v408_v27 = vsel %vm405_vm14, %v407_v21, %v403_v26 }
  0xa7   : > { %413 = vst [vmem:[%s1142_s28] sm:$0x1] %v412_v25  ;;  %v415_v29 = vmul.f32 %v580_v24, %v408_v27 }
  0xa9   : > { %v416_v30 = vadd.f32 %v415_v29, %v414_v28 }
  0xab   : > { %417 = vst [vmem:[%s1142_s28 + $0x1] sm:$0x1] %v416_v30 }
  0xac   : > { %827 = shalt.err (!%p824_p7)
}
  0xad   : > { %595 = dma.vmem_to_hbm [thread:$0]  (%p1045_p10), %s439_s4, 64, %s441_s26, %s426_s8  }
  0xae PF: > { %s1265_s14 = sld [smem:[#allocation17_spill]] }
  0xaf   : > { %s1266_s28 = sld [smem:[#allocation15_spill]] }
  0xb4   : > { %p615_p8 = scmp.ge.s32.totalorder %s1265_s14, 2 }
  0xb5   : > { %s452_s0 = sand.u32 1, %s1266_s28  }
  0xb6   : > { %p609_p4 = pnand %p615_p8, %p1050_p12  ;;  %s453_s1 = scalar_lea.sflag [#allocation5], %s452_s0 }
  0xb8   : > { %p610_p9 = pneg %p609_p4 }
  0xba   : > { %885 = dma.done.wait (%p610_p9), %s453_s1, 64  }
  0xbb   : > { %887 = vsyncadd (%p610_p9), %s453_s1, 4294967232  ;;  %s25_s26 = sadd.s32 1, %s1265_s14   ;;  %s1268_s1 = sld [smem:[#allocation16_spill]] }
  0xbc   : > { %p22_p11 = scmp.ge.s32.totalorder %s25_s26, 6   ;;  %s1269_s5 = sld [smem:[#allocation20_spill]] }
  0xbd   : > { %s1270_s17 = smov %s894_s18  ;;  %s1271_s18 = smov %s898_s19 }
  0xbe   : > { %s1272_s19 = smov %s1100_s12  ;;  %s1273_s20 = smov %s906_s21 }
  0xbf   : > { %s1274_s21 = smov %s910_s22  ;;  %s1275_s22 = smov %s1105_s27 }
  0xc0   : > { %s1276_s23 = smov %s926_s25  ;;  %s1277_s24 = smov %s1280_s16 }
  0xc1   :  { %24 = sbr.rel (!%p22_p11) target bundleno = 17 (0x11), region = 103 }
  0xc2   : > { %s1278_s25 = smov %s1269_s5 }
  0xc6   :  { %459 = vsyncpa [#allocation4], 1 }
  0xc7   :  { %461 = vsyncpa [#allocation4 + $0x1], 1 }
  0xc8   :  { %462 = vsyncpa [#allocation9], 1 }
  0xc9   :  { %464 = vsyncpa [#allocation9 + $0x1], 1 }
  0xca   :  { %465 = vsyncpa [#allocation5], 1 }
  0xcb   :  { %467 = vsyncpa [#allocation5 + $0x1], 1 }
  0xcc   :  { %468 = vsyncpa [#allocation6], 1 }
  0xcd   :  { %470 = vsyncpa [#allocation6 + $0x1], 1 }

</bundles_post_ra>
